<compile_context>
chip_gen: v5e
topology: v5e:2x2
jax: 0.10.0
libtpu: 0.0.40
codegen_flags: <defaults>
</compile_context>

<pallas_src>
import functools

import jax
import jax.numpy as jnp
from jax import lax
from jax.experimental import pallas as pl
from jax.experimental.pallas import tpu as pltpu


def _spatial_attn_kernel(w_ref, m_ref, x_ref, o_ref, *, W):
    # w_ref: SMEM f32[19]        = conv weight (2*3*3) flattened ++ bias (1)
    # m_ref: VMEM f32[9, 1, HW]  = per-tap zero-padding validity masks
    # x_ref: VMEM [Nb, C, HW]    (Nb batch elements, flattened spatial dims)
    # o_ref: VMEM [Nb, C, HW]
    Nb, _, HW = x_ref.shape

    x = x_ref[...].astype(jnp.float32)            # (Nb, C, HW)
    avg = jnp.mean(x, axis=1)                     # (Nb, HW) channel mean
    mx = jnp.max(x, axis=1)                       # (Nb, HW) channel max

    # Bias-initialized accumulator for the 2->1 3x3 conv.
    acc = jnp.full((Nb, HW), w_ref[18], dtype=jnp.float32)

    # Unrolled 3x3 taps. Per tap: combine both pooled planes (linearity), then
    # one lane roll + one mask multiply reproduces SAME zero padding.
    t = 0
    for dy in range(3):
        for dx in range(3):
            sy, sx = dy - 1, dx - 1
            p = w_ref[t] * avg + w_ref[9 + t] * mx          # (Nb, HW)
            k = sy * W + sx
            if k != 0:
                p = jnp.roll(p, -k, axis=1) * m_ref[t]      # mask: (1, HW)
            acc = acc + p
            t += 1

    attn = jax.nn.sigmoid(jnp.maximum(acc, 0.0))            # ReLU -> Sigmoid

    xv = x_ref[...].astype(jnp.float32)                     # re-read (cheap vld)
    o_ref[...] = (xv * attn[:, None, :]).astype(o_ref.dtype)


def ultra_fixed_spatial_attention(x, conv_w, conv_b,
                                  *, batch_block_budget_bytes=1 << 20):
    """x: (N, C, H, W); conv_w: (1, 2, 3, 3); conv_b: (1,)."""
    N, C, H, W = x.shape
    HW = H * W

    w_flat = jnp.concatenate(
        [conv_w.reshape(-1), conv_b.reshape(-1)]).astype(jnp.float32)  # (19,)

    # Precompute the zero-padding validity masks (one per 3x3 tap) in the
    # flattened (HW,) layout so the kernel does no iota / compare work.
    r = jnp.arange(H, dtype=jnp.int32)[:, None]
    c = jnp.arange(W, dtype=jnp.int32)[None, :]
    masks = []
    for dy in range(3):
        for dx in range(3):
            sy, sx = dy - 1, dx - 1
            valid = ((r + sy >= 0) & (r + sy < H) &
                     (c + sx >= 0) & (c + sx < W))
            masks.append(valid.reshape(1, HW).astype(jnp.float32))
    mask_arr = jnp.stack(masks, axis=0)                     # (9, 1, HW)

    # Lane-dense layout: (N, C, H, W) -> (N, C, HW)  (row-major, bitcast-free).
    x_flat = x.reshape(N, C, HW)

    # Batch-block size: biggest divisor of N whose input tile stays within the
    # budget (keeps per-step DMAs large; still well inside v5e's 16 MiB default
    # scoped VMEM even double-buffered for in+out).
    per_elem = C * HW * x.dtype.itemsize
    nb = max(1, min(N, max(1, batch_block_budget_bytes // max(1, per_elem))))
    while N % nb != 0:
        nb -= 1

    kernel = functools.partial(_spatial_attn_kernel, W=W)
    out_flat = pl.pallas_call(
        kernel,
        out_shape=jax.ShapeDtypeStruct((N, C, HW), x.dtype),
        grid=(N // nb,),
        in_specs=[
            pl.BlockSpec(memory_space=pltpu.SMEM),               # weights
            pl.BlockSpec((9, 1, HW), lambda n: (0, 0, 0)),       # tap masks
            pl.BlockSpec((nb, C, HW), lambda n: (n, 0, 0)),      # x tile
        ],
        out_specs=pl.BlockSpec((nb, C, HW), lambda n: (n, 0, 0)),
        compiler_params=pltpu.CompilerParams(
            dimension_semantics=("parallel",)),
    )(w_flat, mask_arr, x_flat)
    # TODO(synk): for very large C*H*W on v7x (64 MiB VMEM), add spatial
    # row-block tiling with a 1-row halo and set vmem_limit_bytes explicitly.
    return out_flat.reshape(N, C, H, W)


def reference(x, conv_w, conv_b):
    avg = jnp.mean(x, axis=1, keepdims=True)
    mx = jnp.max(x, axis=1, keepdims=True)
    s = jnp.concatenate([avg, mx], axis=1)
    y = lax.conv_general_dilated(
        s, conv_w, window_strides=(1, 1), padding="SAME",
        dimension_numbers=("NCHW", "OIHW", "NCHW"))
    y = y + conv_b.reshape(1, -1, 1, 1)
    attn = jax.nn.sigmoid(jnp.maximum(y, 0.0))
    return x * attn


if __name__ == "__main__":
    key = jax.random.PRNGKey(0)
    kx, kw, kb = jax.random.split(key, 3)

    N, C, H, W = 2, 4, 16, 16
    x = jax.random.normal(kx, (N, C, H, W), dtype=jnp.float32)

    # Deterministic parameter init (Conv2d(2, 1, 3, padding=1, bias=True))
    fan_in = 2 * 3 * 3
    bound = 1.0 / (fan_in ** 0.5)
    conv_w = jax.random.uniform(kw, (1, 2, 3, 3), jnp.float32, -bound, bound)
    conv_b = jax.random.uniform(kb, (1,), jnp.float32, -bound, bound)

    out = ultra_fixed_spatial_attention(x, conv_w, conv_b)
    out = jax.block_until_ready(out)

    ref = reference(x, conv_w, conv_b)
    assert out.shape == (N, C, H, W)
    assert jnp.allclose(out, ref, atol=1e-5, rtol=1e-5), (
        float(jnp.max(jnp.abs(out - ref))))

    print("KERNEL_OK")
</pallas_src>

<mosaic_0001>
module attributes {stable_mosaic.version = 11 : i64} {
  func.func @_spatial_attn_kernel(%arg0: i32, %arg1: memref<19xf32, #tpu.memory_space<smem>>, %arg2: memref<9x1x256xf32, #tpu.memory_space<vmem>>, %arg3: memref<2x4x256xf32, #tpu.memory_space<vmem>>, %arg4: memref<2x4x256xf32, #tpu.memory_space<vmem>>) attributes {dimension_semantics = [#tpu.dimension_semantics<parallel>], iteration_bounds = array<i64: 1>, scalar_prefetch = 0 : i64, scratch_operands = 0 : i64, tpu.core_type = #tpu.core_type<tc>, window_params = [{transform_indices = @transform_0, window_bounds = array<i64: 19>}, {pipeline_mode = #tpu.pipeline_mode<synchronous>, transform_indices = @transform_1, window_bounds = array<i64: 9, 1, 256>}, {transform_indices = @transform_2, window_bounds = array<i64: 2, 4, 256>}, {transform_indices = @transform_3, window_bounds = array<i64: 2, 4, 256>}]} {
    %c0 = arith.constant 0 : index
    %c0_0 = arith.constant 0 : index
    %c0_1 = arith.constant 0 : index
    %0 = vector.load %arg3[%c0, %c0_0, %c0_1] : memref<2x4x256xf32, #tpu.memory_space<vmem>>, vector<2x4x256xf32>
    %cst = arith.constant dense<0.000000e+00> : vector<2x256xf32>
    %1 = vector.multi_reduction <add>, %0, %cst [1] : vector<2x4x256xf32> to vector<2x256xf32>
    %cst_2 = arith.constant 4.000000e+00 : f32
    %2 = vector.broadcast %cst_2 : f32 to vector<2x256xf32>
    %3 = arith.divf %1, %2 : vector<2x256xf32>
    %cst_3 = arith.constant dense<0xFF800000> : vector<2x256xf32>
    %4 = vector.multi_reduction <maximumf>, %0, %cst_3 [1] : vector<2x4x256xf32> to vector<2x256xf32>
    %c18 = arith.constant 18 : index
    %5 = memref.load %arg1[%c18] : memref<19xf32, #tpu.memory_space<smem>>
    %6 = vector.broadcast %5 : f32 to vector<2x256xf32>
    %c0_4 = arith.constant 0 : index
    %7 = memref.load %arg1[%c0_4] : memref<19xf32, #tpu.memory_space<smem>>
    %8 = vector.broadcast %7 : f32 to vector<2x256xf32>
    %9 = arith.mulf %8, %3 : vector<2x256xf32>
    %c9 = arith.constant 9 : index
    %10 = memref.load %arg1[%c9] : memref<19xf32, #tpu.memory_space<smem>>
    %11 = vector.broadcast %10 : f32 to vector<2x256xf32>
    %12 = arith.mulf %11, %4 : vector<2x256xf32>
    %13 = arith.addf %9, %12 : vector<2x256xf32>
    %14 = vector.extract_strided_slice %13 {offsets = [0, 239], sizes = [2, 17], strides = [1, 1]} : vector<2x256xf32> to vector<2x17xf32>
    %15 = vector.extract_strided_slice %13 {offsets = [0, 0], sizes = [2, 239], strides = [1, 1]} : vector<2x256xf32> to vector<2x239xf32>
    %16 = tpu.concatenate %14, %15 in 1 : vector<2x17xf32>, vector<2x239xf32> -> vector<2x256xf32>
    %c0_5 = arith.constant 0 : index
    %c0_6 = arith.constant 0 : index
    %c0_7 = arith.constant 0 : index
    %17 = vector.load %arg2[%c0_5, %c0_6, %c0_7] : memref<9x1x256xf32, #tpu.memory_space<vmem>>, vector<1x1x256xf32>
    %18 = vector.shape_cast %17 : vector<1x1x256xf32> to vector<1x256xf32>
    %19 = vector.broadcast %18 : vector<1x256xf32> to vector<2x256xf32>
    %20 = arith.mulf %16, %19 : vector<2x256xf32>
    %21 = arith.addf %6, %20 : vector<2x256xf32>
    %c1 = arith.constant 1 : index
    %22 = memref.load %arg1[%c1] : memref<19xf32, #tpu.memory_space<smem>>
    %23 = vector.broadcast %22 : f32 to vector<2x256xf32>
    %24 = arith.mulf %23, %3 : vector<2x256xf32>
    %c10 = arith.constant 10 : index
    %25 = memref.load %arg1[%c10] : memref<19xf32, #tpu.memory_space<smem>>
    %26 = vector.broadcast %25 : f32 to vector<2x256xf32>
    %27 = arith.mulf %26, %4 : vector<2x256xf32>
    %28 = arith.addf %24, %27 : vector<2x256xf32>
    %29 = vector.extract_strided_slice %28 {offsets = [0, 240], sizes = [2, 16], strides = [1, 1]} : vector<2x256xf32> to vector<2x16xf32>
    %30 = vector.extract_strided_slice %28 {offsets = [0, 0], sizes = [2, 240], strides = [1, 1]} : vector<2x256xf32> to vector<2x240xf32>
    %31 = tpu.concatenate %29, %30 in 1 : vector<2x16xf32>, vector<2x240xf32> -> vector<2x256xf32>
    %c1_8 = arith.constant 1 : index
    %c0_9 = arith.constant 0 : index
    %c0_10 = arith.constant 0 : index
    %32 = vector.load %arg2[%c1_8, %c0_9, %c0_10] : memref<9x1x256xf32, #tpu.memory_space<vmem>>, vector<1x1x256xf32>
    %33 = vector.shape_cast %32 : vector<1x1x256xf32> to vector<1x256xf32>
    %34 = vector.broadcast %33 : vector<1x256xf32> to vector<2x256xf32>
    %35 = arith.mulf %31, %34 : vector<2x256xf32>
    %36 = arith.addf %21, %35 : vector<2x256xf32>
    %c2 = arith.constant 2 : index
    %37 = memref.load %arg1[%c2] : memref<19xf32, #tpu.memory_space<smem>>
    %38 = vector.broadcast %37 : f32 to vector<2x256xf32>
    %39 = arith.mulf %38, %3 : vector<2x256xf32>
    %c11 = arith.constant 11 : index
    %40 = memref.load %arg1[%c11] : memref<19xf32, #tpu.memory_space<smem>>
    %41 = vector.broadcast %40 : f32 to vector<2x256xf32>
    %42 = arith.mulf %41, %4 : vector<2x256xf32>
    %43 = arith.addf %39, %42 : vector<2x256xf32>
    %44 = vector.extract_strided_slice %43 {offsets = [0, 241], sizes = [2, 15], strides = [1, 1]} : vector<2x256xf32> to vector<2x15xf32>
    %45 = vector.extract_strided_slice %43 {offsets = [0, 0], sizes = [2, 241], strides = [1, 1]} : vector<2x256xf32> to vector<2x241xf32>
    %46 = tpu.concatenate %44, %45 in 1 : vector<2x15xf32>, vector<2x241xf32> -> vector<2x256xf32>
    %c2_11 = arith.constant 2 : index
    %c0_12 = arith.constant 0 : index
    %c0_13 = arith.constant 0 : index
    %47 = vector.load %arg2[%c2_11, %c0_12, %c0_13] : memref<9x1x256xf32, #tpu.memory_space<vmem>>, vector<1x1x256xf32>
    %48 = vector.shape_cast %47 : vector<1x1x256xf32> to vector<1x256xf32>
    %49 = vector.broadcast %48 : vector<1x256xf32> to vector<2x256xf32>
    %50 = arith.mulf %46, %49 : vector<2x256xf32>
    %51 = arith.addf %36, %50 : vector<2x256xf32>
    %c3 = arith.constant 3 : index
    %52 = memref.load %arg1[%c3] : memref<19xf32, #tpu.memory_space<smem>>
    %53 = vector.broadcast %52 : f32 to vector<2x256xf32>
    %54 = arith.mulf %53, %3 : vector<2x256xf32>
    %c12 = arith.constant 12 : index
    %55 = memref.load %arg1[%c12] : memref<19xf32, #tpu.memory_space<smem>>
    %56 = vector.broadcast %55 : f32 to vector<2x256xf32>
    %57 = arith.mulf %56, %4 : vector<2x256xf32>
    %58 = arith.addf %54, %57 : vector<2x256xf32>
    %59 = vector.extract_strided_slice %58 {offsets = [0, 255], sizes = [2, 1], strides = [1, 1]} : vector<2x256xf32> to vector<2x1xf32>
    %60 = vector.extract_strided_slice %58 {offsets = [0, 0], sizes = [2, 255], strides = [1, 1]} : vector<2x256xf32> to vector<2x255xf32>
    %61 = tpu.concatenate %59, %60 in 1 : vector<2x1xf32>, vector<2x255xf32> -> vector<2x256xf32>
    %c3_14 = arith.constant 3 : index
    %c0_15 = arith.constant 0 : index
    %c0_16 = arith.constant 0 : index
    %62 = vector.load %arg2[%c3_14, %c0_15, %c0_16] : memref<9x1x256xf32, #tpu.memory_space<vmem>>, vector<1x1x256xf32>
    %63 = vector.shape_cast %62 : vector<1x1x256xf32> to vector<1x256xf32>
    %64 = vector.broadcast %63 : vector<1x256xf32> to vector<2x256xf32>
    %65 = arith.mulf %61, %64 : vector<2x256xf32>
    %66 = arith.addf %51, %65 : vector<2x256xf32>
    %c4 = arith.constant 4 : index
    %67 = memref.load %arg1[%c4] : memref<19xf32, #tpu.memory_space<smem>>
    %68 = vector.broadcast %67 : f32 to vector<2x256xf32>
    %69 = arith.mulf %68, %3 : vector<2x256xf32>
    %c13 = arith.constant 13 : index
    %70 = memref.load %arg1[%c13] : memref<19xf32, #tpu.memory_space<smem>>
    %71 = vector.broadcast %70 : f32 to vector<2x256xf32>
    %72 = arith.mulf %71, %4 : vector<2x256xf32>
    %73 = arith.addf %69, %72 : vector<2x256xf32>
    %74 = arith.addf %66, %73 : vector<2x256xf32>
    %c5 = arith.constant 5 : index
    %75 = memref.load %arg1[%c5] : memref<19xf32, #tpu.memory_space<smem>>
    %76 = vector.broadcast %75 : f32 to vector<2x256xf32>
    %77 = arith.mulf %76, %3 : vector<2x256xf32>
    %c14 = arith.constant 14 : index
    %78 = memref.load %arg1[%c14] : memref<19xf32, #tpu.memory_space<smem>>
    %79 = vector.broadcast %78 : f32 to vector<2x256xf32>
    %80 = arith.mulf %79, %4 : vector<2x256xf32>
    %81 = arith.addf %77, %80 : vector<2x256xf32>
    %82 = vector.extract_strided_slice %81 {offsets = [0, 1], sizes = [2, 255], strides = [1, 1]} : vector<2x256xf32> to vector<2x255xf32>
    %83 = vector.extract_strided_slice %81 {offsets = [0, 0], sizes = [2, 1], strides = [1, 1]} : vector<2x256xf32> to vector<2x1xf32>
    %84 = tpu.concatenate %82, %83 in 1 : vector<2x255xf32>, vector<2x1xf32> -> vector<2x256xf32>
    %c5_17 = arith.constant 5 : index
    %c0_18 = arith.constant 0 : index
    %c0_19 = arith.constant 0 : index
    %85 = vector.load %arg2[%c5_17, %c0_18, %c0_19] : memref<9x1x256xf32, #tpu.memory_space<vmem>>, vector<1x1x256xf32>
    %86 = vector.shape_cast %85 : vector<1x1x256xf32> to vector<1x256xf32>
    %87 = vector.broadcast %86 : vector<1x256xf32> to vector<2x256xf32>
    %88 = arith.mulf %84, %87 : vector<2x256xf32>
    %89 = arith.addf %74, %88 : vector<2x256xf32>
    %c6 = arith.constant 6 : index
    %90 = memref.load %arg1[%c6] : memref<19xf32, #tpu.memory_space<smem>>
    %91 = vector.broadcast %90 : f32 to vector<2x256xf32>
    %92 = arith.mulf %91, %3 : vector<2x256xf32>
    %c15 = arith.constant 15 : index
    %93 = memref.load %arg1[%c15] : memref<19xf32, #tpu.memory_space<smem>>
    %94 = vector.broadcast %93 : f32 to vector<2x256xf32>
    %95 = arith.mulf %94, %4 : vector<2x256xf32>
    %96 = arith.addf %92, %95 : vector<2x256xf32>
    %97 = vector.extract_strided_slice %96 {offsets = [0, 15], sizes = [2, 241], strides = [1, 1]} : vector<2x256xf32> to vector<2x241xf32>
    %98 = vector.extract_strided_slice %96 {offsets = [0, 0], sizes = [2, 15], strides = [1, 1]} : vector<2x256xf32> to vector<2x15xf32>
    %99 = tpu.concatenate %97, %98 in 1 : vector<2x241xf32>, vector<2x15xf32> -> vector<2x256xf32>
    %c6_20 = arith.constant 6 : index
    %c0_21 = arith.constant 0 : index
    %c0_22 = arith.constant 0 : index
    %100 = vector.load %arg2[%c6_20, %c0_21, %c0_22] : memref<9x1x256xf32, #tpu.memory_space<vmem>>, vector<1x1x256xf32>
    %101 = vector.shape_cast %100 : vector<1x1x256xf32> to vector<1x256xf32>
    %102 = vector.broadcast %101 : vector<1x256xf32> to vector<2x256xf32>
    %103 = arith.mulf %99, %102 : vector<2x256xf32>
    %104 = arith.addf %89, %103 : vector<2x256xf32>
    %c7 = arith.constant 7 : index
    %105 = memref.load %arg1[%c7] : memref<19xf32, #tpu.memory_space<smem>>
    %106 = vector.broadcast %105 : f32 to vector<2x256xf32>
    %107 = arith.mulf %106, %3 : vector<2x256xf32>
    %c16 = arith.constant 16 : index
    %108 = memref.load %arg1[%c16] : memref<19xf32, #tpu.memory_space<smem>>
    %109 = vector.broadcast %108 : f32 to vector<2x256xf32>
    %110 = arith.mulf %109, %4 : vector<2x256xf32>
    %111 = arith.addf %107, %110 : vector<2x256xf32>
    %112 = vector.extract_strided_slice %111 {offsets = [0, 16], sizes = [2, 240], strides = [1, 1]} : vector<2x256xf32> to vector<2x240xf32>
    %113 = vector.extract_strided_slice %111 {offsets = [0, 0], sizes = [2, 16], strides = [1, 1]} : vector<2x256xf32> to vector<2x16xf32>
    %114 = tpu.concatenate %112, %113 in 1 : vector<2x240xf32>, vector<2x16xf32> -> vector<2x256xf32>
    %c7_23 = arith.constant 7 : index
    %c0_24 = arith.constant 0 : index
    %c0_25 = arith.constant 0 : index
    %115 = vector.load %arg2[%c7_23, %c0_24, %c0_25] : memref<9x1x256xf32, #tpu.memory_space<vmem>>, vector<1x1x256xf32>
    %116 = vector.shape_cast %115 : vector<1x1x256xf32> to vector<1x256xf32>
    %117 = vector.broadcast %116 : vector<1x256xf32> to vector<2x256xf32>
    %118 = arith.mulf %114, %117 : vector<2x256xf32>
    %119 = arith.addf %104, %118 : vector<2x256xf32>
    %c8 = arith.constant 8 : index
    %120 = memref.load %arg1[%c8] : memref<19xf32, #tpu.memory_space<smem>>
    %121 = vector.broadcast %120 : f32 to vector<2x256xf32>
    %122 = arith.mulf %121, %3 : vector<2x256xf32>
    %c17 = arith.constant 17 : index
    %123 = memref.load %arg1[%c17] : memref<19xf32, #tpu.memory_space<smem>>
    %124 = vector.broadcast %123 : f32 to vector<2x256xf32>
    %125 = arith.mulf %124, %4 : vector<2x256xf32>
    %126 = arith.addf %122, %125 : vector<2x256xf32>
    %127 = vector.extract_strided_slice %126 {offsets = [0, 17], sizes = [2, 239], strides = [1, 1]} : vector<2x256xf32> to vector<2x239xf32>
    %128 = vector.extract_strided_slice %126 {offsets = [0, 0], sizes = [2, 17], strides = [1, 1]} : vector<2x256xf32> to vector<2x17xf32>
    %129 = tpu.concatenate %127, %128 in 1 : vector<2x239xf32>, vector<2x17xf32> -> vector<2x256xf32>
    %c8_26 = arith.constant 8 : index
    %c0_27 = arith.constant 0 : index
    %c0_28 = arith.constant 0 : index
    %130 = vector.load %arg2[%c8_26, %c0_27, %c0_28] : memref<9x1x256xf32, #tpu.memory_space<vmem>>, vector<1x1x256xf32>
    %131 = vector.shape_cast %130 : vector<1x1x256xf32> to vector<1x256xf32>
    %132 = vector.broadcast %131 : vector<1x256xf32> to vector<2x256xf32>
    %133 = arith.mulf %129, %132 : vector<2x256xf32>
    %134 = arith.addf %119, %133 : vector<2x256xf32>
    %cst_29 = arith.constant 0.000000e+00 : f32
    %135 = vector.broadcast %cst_29 : f32 to vector<2x256xf32>
    %136 = arith.maximumf %134, %135 : vector<2x256xf32>
    %137 = arith.negf %136 : vector<2x256xf32>
    %138 = math.exp %137 : vector<2x256xf32>
    %cst_30 = arith.constant 1.000000e+00 : f32
    %139 = vector.broadcast %cst_30 : f32 to vector<2x256xf32>
    %140 = arith.addf %139, %138 : vector<2x256xf32>
    %141 = arith.divf %139, %140 : vector<2x256xf32>
    %c0_31 = arith.constant 0 : index
    %c0_32 = arith.constant 0 : index
    %c0_33 = arith.constant 0 : index
    %142 = vector.load %arg3[%c0_31, %c0_32, %c0_33] : memref<2x4x256xf32, #tpu.memory_space<vmem>>, vector<2x4x256xf32>
    %143 = vector.shape_cast %141 : vector<2x256xf32> to vector<2x1x256xf32>
    %144 = vector.broadcast %143 : vector<2x1x256xf32> to vector<2x4x256xf32>
    %145 = arith.mulf %142, %144 : vector<2x4x256xf32>
    %c0_34 = arith.constant 0 : index
    %c0_35 = arith.constant 0 : index
    %c0_36 = arith.constant 0 : index
    %146 = vector.load %arg4[%c0_34, %c0_35, %c0_36] : memref<2x4x256xf32, #tpu.memory_space<vmem>>, vector<2x4x256xf32>
    tpu.vector_store %arg4[%c0_34, %c0_35, %c0_36], %145 {strides = array<i32>} : memref<2x4x256xf32, #tpu.memory_space<vmem>>, vector<2x4x256xf32>,
    return
  }
  func.func @transform_0(%arg0: i32) -> i32 {
    %c0_i32 = arith.constant 0 : i32
    %c0_i32_0 = arith.constant 0 : i32
    return %c0_i32 : i32
  }
  func.func @transform_1(%arg0: i32) -> (i32, i32, i32) {
    %c0_i32 = arith.constant 0 : i32
    %c0_i32_0 = arith.constant 0 : i32
    %c0_i32_1 = arith.constant 0 : i32
    %c0_i32_2 = arith.constant 0 : i32
    return %c0_i32, %c0_i32_0, %c0_i32_1 : i32, i32, i32
  }
  func.func @transform_2(%arg0: i32) -> (i32, i32, i32) {
    %c0_i32 = arith.constant 0 : i32
    %c0_i32_0 = arith.constant 0 : i32
    %c0_i32_1 = arith.constant 0 : i32
    return %arg0, %c0_i32, %c0_i32_0 : i32, i32, i32
  }
  func.func @transform_3(%arg0: i32) -> (i32, i32, i32) {
    %c0_i32 = arith.constant 0 : i32
    %c0_i32_0 = arith.constant 0 : i32
    %c0_i32_1 = arith.constant 0 : i32
    return %arg0, %c0_i32, %c0_i32_0 : i32, i32, i32
  }
}

</mosaic_0001>

<bundles_post_ra>
// kernel: tpu_custom_call.1
= control target key start
LH: loop header
LB: loop body
LE: loop exit
PB: predicated region body
PF: predicated region fallthrough
CT: control target
= control target key end

     0   :  { %8 = vsyncpa [#allocation5], 0  ;;  %s985_s0 = inlined_call_operand.hbm [shape: f32[19], index: 0, kind: input, shape index: {}]   ;;  %s986_s1 = inlined_call_operand.hbm [shape: f32[9,1,256], index: 1, kind: input, shape index: {}]   ;;  %s987_s2 = inlined_call_operand.hbm [shape: f32[2,4,256], index: 2, kind: input, shape index: {}]   ;;  %s988_s3 = inlined_call_operand.hbm [shape: f32[2,4,256], index: 3, kind: output, shape index: {}]  }
   0x1   :  { %9 = vsyncpa [#allocation3], 0 }
   0x2   :  { %10 = vsyncpa [#allocation8], 0 }
   0x3   :  { %11 = vsyncpa [#allocation4], 0  ;;  %s17_s14 = sshll.u32 %s985_s0, 4  ;;  %s25_s17 = sshll.u32 %s986_s1, 4  ;;  %s18_s14 = int_to_ptr.hbm [resolvable:$true] %s17_s14  ;;  %s26_s17 = int_to_ptr.hbm [resolvable:$true] %s25_s17 }
   0x4   :  { %s747_s18 = smov [#allocation2]   ;;  %s748_s19 = smov [#allocation6]  }
   0x5   :  { %20 = dma.hbm_to_smem %s18_s14, 16, %s747_s18, [#allocation5]  }
   0x6   :  { %s27_s20 = sshll.u32 %s748_s19, 4  ;;  %s749_s21 = smov 32   ;;  %s28_s20 = int_to_ptr.vmem [resolvable:$true] %s27_s20 }
   0x7   :  { %s750_s22 = smov 2   ;;  %s38_s25 = sshll.u32 %s987_s2, 4  ;;  %s39_s25 = int_to_ptr.hbm [resolvable:$true] %s38_s25 }
   0x8   :  { %33 = dma.hbm_to_vmem [thread:$0]  %s26_s17, 288, %s28_s20, [#allocation3], %s749_s21, %s749_s21, %s750_s22  }
   0x9   :  { %s751_s0 = smov [#allocation7]   ;;  %s752_s27 = smov 128  }
   0xa   :  { %s40_s26 = sshll.u32 %s751_s0, 4  ;;  %s753_s28 = smov 8   ;;  %s41_s26 = int_to_ptr.vmem [resolvable:$true] %s40_s26 }
   0xb   :  { %46 = dma.hbm_to_vmem [thread:$0]  %s39_s25, 256, %s41_s26, [#allocation8], %s752_s27, %s752_s27, %s753_s28  }
   0xc   :  { %739 = dma.done.wait [#allocation5], 16  }
   0xd   :  { %740 = vsyncadd [#allocation5], 4294967280 }
   0xe   :  { %741 = dma.done.wait [#allocation3], 288  }
   0xf   :  { %742 = vsyncadd [#allocation3], 4294967008 }
  0x10   :  { %743 = dma.done.wait [#allocation8], 256  }
  0x11   :  { %744 = vsyncadd [#allocation8], 4294967040 }
  0x12   :  { %59 = sfence }
  0x13   :  { %v796_v0 = vld [vmem:[#allocation7] sm:$0xff]  ;;  %v798_v1 = vld [vmem:[#allocation7 + $0x8] sm:$0xff]  ;;  %v754_v2 = vmov 4.0   ;;  %vm75_vm0 = vcmask 1043456   ;;  %s808_s1 = sld [smem:[#allocation2 + $0x1]]  ;;  %vm174_vm2 = vcmask 1041409  }
  0x14   :  { %64 = vst [vmem:[#allocation1] ss:$2 sm:$0xff] %v796_v0  ;;  %645 = vrcp.f32 %v754_v2  ;;  %s810_s2 = sld [smem:[#allocation2 + $0xa]]  ;;  %s755_s11 = smov 16   ;;  %vm184_vm3 = vcmask 138240   ;;  %vm269_vm4 = vcmask 121856  }
  0x15   :  { %68 = vst [vmem:[#allocation1 + $0x10] ss:$2 sm:$0xff] %v798_v1  ;;  %s812_s29 = sld [smem:[#allocation2]]  ;;  %s756_s12 = smov 17   ;;  %vm226_vm5 = vcmask 130048   ;;  %vm312_vm6 = vcmask 7168  }
  0x16   :  { %s814_s30 = sld [smem:[#allocation2 + $0x9]]  ;;  %s757_s15 = smov 15   ;;  %vm380_vm7 = vcmask 1039360   ;;  %vm423_vm8 = vcmask 924672   ;;  %vm466_vm9 = vcmask 916480   ;;  %vm509_vm10 = vcmask 908288  }
  0x17   :  { %s817_s4 = sld [smem:[#allocation2 + $0x3]]  ;;  %s758_s17 = smov 1  }
  0x18   :  { %s820_s5 = sld [smem:[#allocation2 + $0xc]]  ;;  %s759_s20 = smov 127  }
  0x19   :  { %v200_v56 = vstv %s808_s1  ;;  %s834_s6 = sld [smem:[#allocation2 + $0x2]]  ;;  %s760_s21 = smov 113  }
  0x1a   :  { %v646_v3 = vpop.eup %645  ;;  %v827_v57 = vstv %s810_s2  ;;  %s848_s7 = sld [smem:[#allocation2 + $0xb]]  ;;  %s761_s22 = smov 112  }
  0x1b   :  { %v65_v4 = vld.sshfl [vmem:[#allocation1] sm:$0xff pattern:$0x75316420]  ;;  %v66_v5 = vld.sshfl [vmem:[#allocation1 + $0x8] sm:$0xff pattern:$0x75316420]  ;;  %vm109_vm1 = vweird.f32 %v646_v3  ;;  %v157_v62 = vstv %s812_s29 }
  0x1c   :  { %v69_v6 = vld.sshfl [vmem:[#allocation1 + $0x10] sm:$0xff pattern:$0x75316420]  ;;  %v70_v7 = vld.sshfl [vmem:[#allocation1 + $0x18] sm:$0xff pattern:$0x75316420]  ;;  %v163_v2 = vstv %s814_s30 }
  0x1d   :  { %v83_v8 = vsel %vm75_vm0, %v66_v5, 0.0  ;;  %v97_v9 = vsel %vm75_vm0, %v70_v7, 0.0  ;;  %v105_v10 = vmul.f32 4.0, %v646_v3  ;;  %115 = vst [vmem:[#allocation1] ss:$2 sm:$0xff] %v796_v0  ;;  %v76_v13 = vsel %vm75_vm0, %v65_v4, 0.0 }
  0x1e   :  { %v84_v11 = vrot.slane %v83_v8, 4  ;;  %v98_v12 = vrot.slane %v97_v9, 4  ;;  %119 = vst [vmem:[#allocation1 + $0x10] ss:$2 sm:$0xff] %v798_v1  ;;  %v90_v14 = vsel %vm75_vm0, %v69_v6, 0.0  ;;  %v77_v16 = vrot.slane %v76_v13, 4 }
  0x1f   :  { %v106_v15 = vsub.f32 1.0, %v105_v10  ;;  %v91_v17 = vrot.slane %v90_v14, 4  ;;  %s865_s8 = sld [smem:[#allocation2 + $0x6]]  ;;  %s762_s23 = smov 111  }
  0x20   :  { %v85_v18 = vadd.f32 %v84_v11, %v83_v8  ;;  %v99_v19 = vadd.f32 %v98_v12, %v97_v9  ;;  %v78_v21 = vadd.f32 %v77_v16, %v76_v13  ;;  %v286_v8 = vstv %s817_s4  ;;  %s873_s9 = sld [smem:[#allocation2 + $0xf]]  ;;  %s763_s26 = smov [#allocation9]  }
  0x21   :  { %v107_v20 = vmul.f32 %v646_v3, %v106_v15  ;;  %v92_v22 = vadd.f32 %v91_v17, %v90_v14  ;;  %v292_v12 = vstv %s820_s5  ;;  %s880_s10 = sld [smem:[#allocation2 + $0x5]]  ;;  %s591_s1 = sshll.u32 %s763_s26, 4  ;;  %s592_s1 = int_to_ptr.vmem [resolvable:$true] %s591_s1 }
  0x22   :  { %v86_v23 = vrot.slane %v85_v18, 2  ;;  %v100_v24 = vrot.slane %v99_v19, 2  ;;  %v79_v25 = vrot.slane %v78_v21, 2  ;;  %s887_s13 = sld [smem:[#allocation2 + $0xe]]  ;;  %s593_s30 = sshll.u32 %s988_s3, 4  ;;  %s594_s30 = int_to_ptr.hbm [resolvable:$true] %s593_s30 }
  0x23   :  { %v93_v26 = vrot.slane %v92_v22, 2  ;;  %v108_v31 = vadd.f32 %v646_v3, %v107_v20  ;;  %s622_s14 = sld [smem:[#allocation2 + $0x7]] }
  0x24   :  { %v87_v27 = vadd.f32 %v86_v23, %v85_v18  ;;  %v101_v28 = vadd.f32 %v100_v24, %v99_v19  ;;  %v117_v29 = vld.sshfl [vmem:[#allocation1 + $0x8] sm:$0xff pattern:$0x75316420]  ;;  %v116_v30 = vld.sshfl [vmem:[#allocation1] sm:$0xff pattern:$0x75316420]  ;;  %v80_v34 = vadd.f32 %v79_v25, %v78_v21 }
  0x25   :  { %v121_v32 = vld.sshfl [vmem:[#allocation1 + $0x18] sm:$0xff pattern:$0x75316420]  ;;  %v133_v33 = vsel %vm75_vm0, %v117_v29, -inf  ;;  %v94_v35 = vadd.f32 %v93_v26, %v92_v22  ;;  %v126_v47 = vsel %vm75_vm0, %v116_v30, -inf  ;;  %v110_v48 = vsel %vm109_vm1, %v646_v3, %v108_v31  ;;  %s623_s16 = sld [smem:[#allocation2 + $0x10]] }
  0x26   :  { %v88_v36 = vrot.slane %v87_v27, 1  ;;  %v102_v37 = vrot.slane %v101_v28, 1  ;;  %v134_v38 = vrot.slane %v133_v33, 4  ;;  %v147_v39 = vsel %vm75_vm0, %v121_v32, -inf  ;;  %s624_s18 = sld [smem:[#allocation2 + $0x8]] }
  0x27   :  { %v148_v40 = vrot.slane %v147_v39, 4  ;;  %v81_v41 = vrot.slane %v80_v34, 1  ;;  %v95_v42 = vrot.slane %v94_v35, 1  ;;  %v120_v43 = vld.sshfl [vmem:[#allocation1 + $0x10] sm:$0xff pattern:$0x75316420]  ;;  %v243_v32 = vstv %s834_s6 }
  0x28   :  { %v89_v44 = vadd.f32 %v88_v36, %v87_v27  ;;  %v103_v45 = vadd.f32 %v102_v37, %v101_v28  ;;  %v135_v46 = vmax.f32 %v133_v33, %v134_v38  ;;  %v127_v50 = vrot.slane %v126_v47, 4  ;;  %s625_s19 = sld [smem:[#allocation2 + $0x11]] }
  0x29   :  { %v149_v49 = vmax.f32 %v147_v39, %v148_v40  ;;  %v82_v52 = vadd.f32 %v81_v41, %v80_v34  ;;  %v96_v53 = vadd.f32 %v95_v42, %v94_v35  ;;  %v140_v54 = vsel %vm75_vm0, %v120_v43, -inf  ;;  %s955_s24 = sld [smem:[#allocation2 + $0x12]] }
  0x2a   :  { %v136_v51 = vrot.slane %v135_v46, 2  ;;  %v128_v58 = vmax.f32 %v126_v47, %v127_v50  ;;  %v829_v59 = vmul.f32 %v110_v48, %v89_v44  ;;  %v831_v60 = vmul.f32 %v110_v48, %v103_v45  ;;  %s616_s25 = sld [smem:[#allocation2 + $0x4]] }
  0x2b   :  { %v150_v55 = vrot.slane %v149_v49, 2  ;;  %v141_v4 = vrot.slane %v140_v54, 4  ;;  %v837_v6 = vmul.f32 %v110_v48, %v82_v52  ;;  %v839_v7 = vmul.f32 %v110_v48, %v96_v53  ;;  %s617_s0 = sld [smem:[#allocation2 + $0xd]] }
  0x2c   :  { %v137_v61 = vmax.f32 %v135_v46, %v136_v51  ;;  %v129_v3 = vrot.slane %v128_v58, 2  ;;  %v202_v14 = vmul.f32 %v200_v56, %v829_v59  ;;  %v204_v15 = vmul.f32 %v200_v56, %v831_v60 }
  0x2d   :  { %v151_v63 = vmax.f32 %v149_v49, %v150_v55  ;;  %v142_v11 = vmax.f32 %v140_v54, %v141_v4  ;;  %v159_v16 = vmul.f32 %v157_v62, %v829_v59  ;;  %v161_v18 = vmul.f32 %v157_v62, %v831_v60 }
  0x2e   :  { %v138_v5 = vrot.slane %v137_v61, 1  ;;  %v130_v10 = vmax.f32 %v128_v58, %v129_v3  ;;  %v201_v23 = vmul.f32 %v200_v56, %v837_v6  ;;  %v203_v24 = vmul.f32 %v200_v56, %v839_v7 }
  0x2f   :  { %v152_v9 = vrot.slane %v151_v63, 1  ;;  %v143_v20 = vrot.slane %v142_v11, 2  ;;  %v158_v31 = vmul.f32 %v157_v62, %v837_v6  ;;  %v160_v37 = vmul.f32 %v157_v62, %v839_v7 }
  0x30   :  { %v843_v13 = vmax.f32 %v137_v61, %v138_v5  ;;  %v131_v19 = vrot.slane %v130_v10, 1  ;;  %v287_v39 = vmul.f32 %v286_v8, %v837_v6  ;;  %v289_v40 = vmul.f32 %v286_v8, %v839_v7 }
  0x31   :  { %v850_v17 = vmax.f32 %v151_v63, %v152_v9  ;;  %v144_v28 = vmax.f32 %v142_v11, %v143_v20  ;;  %v288_v44 = vmul.f32 %v286_v8, %v829_v59  ;;  %v290_v46 = vmul.f32 %v286_v8, %v831_v60 }
  0x32   :  { %v208_v21 = vmul.f32 %v827_v57, %v843_v13  ;;  %v165_v22 = vmul.f32 %v163_v2, %v843_v13  ;;  %v861_v27 = vmax.f32 %v130_v10, %v131_v19  ;;  %v245_v47 = vmul.f32 %v243_v32, %v829_v59 }
  0x33   :  { %v210_v25 = vmul.f32 %v827_v57, %v850_v17  ;;  %v167_v26 = vmul.f32 %v163_v2, %v850_v17  ;;  %v145_v35 = vrot.slane %v144_v28, 1  ;;  %v249_v48 = vstv %s848_s7 }
  0x34   :  { %v212_v29 = vadd.f32 %v208_v21, %v202_v14  ;;  %v169_v30 = vadd.f32 %v165_v22, %v159_v16  ;;  %v207_v36 = vmul.f32 %v827_v57, %v861_v27  ;;  %v164_v38 = vmul.f32 %v163_v2, %v861_v27 }
  0x35   :  { %v214_v33 = vadd.f32 %v210_v25, %v204_v15  ;;  %v171_v34 = vadd.f32 %v167_v26, %v161_v18  ;;  %v877_v43 = vmax.f32 %v144_v28, %v145_v35  ;;  %v247_v52 = vmul.f32 %v243_v32, %v831_v60 }
  0x36   :  { %v211_v45 = vadd.f32 %v207_v36, %v201_v23  ;;  %v168_v51 = vadd.f32 %v164_v38, %v158_v31  ;;  %v294_v53 = vmul.f32 %v292_v12, %v843_v13  ;;  %v296_v54 = vmul.f32 %v292_v12, %v850_v17 }
  0x37   :  { %v217_v41 = vsel %vm174_vm2, %v214_v33, %v212_v29  ;;  %v175_v42 = vsel %vm174_vm2, %v171_v34, %v169_v30  ;;  %v209_v49 = vmul.f32 %v827_v57, %v877_v43  ;;  %v166_v50 = vmul.f32 %v163_v2, %v877_v43 }
  0x38   :  { %218 = vrot.lane.b32.xlu1 %v217_v41, %s755_s11  ;;  %176 = vrot.lane.b32.xlu0 %v175_v42, %s756_s12  ;;  %v251_v55 = vmul.f32 %v249_v48, %v843_v13  ;;  %v253_v56 = vmul.f32 %v249_v48, %v850_v17  ;;  %v293_v62 = vmul.f32 %v292_v12, %v861_v27  ;;  %v398_v3 = vstv %s865_s8 }
  0x39   :  { %v213_v58 = vadd.f32 %v209_v49, %v203_v24  ;;  %v170_v61 = vadd.f32 %v166_v50, %v160_v37  ;;  %v295_v57 = vmul.f32 %v292_v12, %v877_v43  ;;  %v298_v8 = vadd.f32 %v294_v53, %v288_v44 }
  0x3a   :  { %v255_v63 = vadd.f32 %v251_v55, %v245_v47  ;;  %v257_v2 = vadd.f32 %v253_v56, %v247_v52  ;;  %v300_v9 = vadd.f32 %v296_v54, %v290_v46  ;;  %v404_v11 = vstv %s873_s9 }
  0x3b   :  { %v223_v4 = vsel %vm174_vm2, %v213_v58, %v211_v45  ;;  %v181_v5 = vsel %vm174_vm2, %v170_v61, %v168_v51  ;;  %v297_v14 = vadd.f32 %v293_v62, %v287_v39  ;;  %v299_v15 = vadd.f32 %v295_v57, %v289_v40 }
  0x3c   :  { %v260_v10 = vsel %vm174_vm2, %v257_v2, %v255_v63  ;;  %v399_v12 = vmul.f32 %v398_v3, %v837_v6  ;;  %v355_v16 = vstv %s880_s10  ;;  %v401_v18 = vmul.f32 %v398_v3, %v839_v7 }
  0x3d   :  { %261 = vrot.lane.b32.xlu2 %v260_v10, %s757_s15  ;;  %v361_v19 = vstv %s887_s13  ;;  %v244_v20 = vmul.f32 %v243_v32, %v837_v6  ;;  %v246_v21 = vmul.f32 %v243_v32, %v839_v7  ;;  %v405_v22 = vmul.f32 %v404_v11, %v861_v27 }
  0x3e   :  { %v407_v23 = vmul.f32 %v404_v11, %v877_v43  ;;  %v250_v24 = vmul.f32 %v249_v48, %v861_v27  ;;  %v252_v25 = vmul.f32 %v249_v48, %v877_v43  ;;  %v357_v26 = vmul.f32 %v355_v16, %v829_v59 }
  0x3f   :  { %v359_v28 = vmul.f32 %v355_v16, %v831_v60  ;;  %v363_v29 = vmul.f32 %v361_v19, %v843_v13  ;;  %v365_v30 = vmul.f32 %v361_v19, %v850_v17  ;;  %v303_v32 = vsel %vm174_vm2, %v300_v9, %v298_v8 }
  0x40   :  { %224 = vrot.lane.b32.xlu1 %v223_v4, %s755_s11  ;;  %182 = vrot.lane.b32.xlu0 %v181_v5, %s756_s12  ;;  %v254_v31 = vadd.f32 %v250_v24, %v244_v20  ;;  %v256_v33 = vadd.f32 %v252_v25, %v246_v21  ;;  %v309_v34 = vsel %vm174_vm2, %v299_v15, %v297_v14  ;;  %v441_v38 = vstv %s622_s14 }
  0x41   :  { %v409_v35 = vadd.f32 %v405_v22, %v399_v12  ;;  %v411_v36 = vadd.f32 %v407_v23, %v401_v18  ;;  %v367_v39 = vadd.f32 %v363_v29, %v357_v26  ;;  %v369_v40 = vadd.f32 %v365_v30, %v359_v28 }
  0x42   :  { %v266_v37 = vsel %vm174_vm2, %v256_v33, %v254_v31  ;;  %v447_v41 = vstv %s623_s16  ;;  %v356_v42 = vmul.f32 %v355_v16, %v837_v6  ;;  %v358_v44 = vmul.f32 %v355_v16, %v839_v7 }
  0x43   :  { %v417_v45 = vsel %vm174_vm2, %v411_v36, %v409_v35  ;;  %v362_v46 = vmul.f32 %v361_v19, %v861_v27  ;;  %v364_v47 = vmul.f32 %v361_v19, %v877_v43  ;;  %v443_v48 = vmul.f32 %v441_v38, %v829_v59 }
  0x44   :  { %v445_v49 = vmul.f32 %v441_v38, %v831_v60  ;;  %v449_v50 = vmul.f32 %v447_v41, %v843_v13  ;;  %v451_v51 = vmul.f32 %v447_v41, %v850_v17  ;;  %v375_v52 = vsel %vm174_vm2, %v369_v40, %v367_v39  ;;  %v189_v39 = vld [vmem:[#allocation6] sm:$0x3] }
  0x45   :  { %267 = vrot.lane.b32.xlu2 %v266_v37, %s757_s15  ;;  %v442_v53 = vmul.f32 %v441_v38, %v837_v6  ;;  %v366_v54 = vadd.f32 %v362_v46, %v356_v42  ;;  %v368_v55 = vadd.f32 %v364_v47, %v358_v44  ;;  %v400_v56 = vmul.f32 %v398_v3, %v829_v59  ;;  %v275_v46 = vld [vmem:[#allocation6 + $0x4] sm:$0x3]  ;;  %v232_v47 = vld [vmem:[#allocation6 + $0x2] sm:$0x3] }
  0x46   :  { %v402_v58 = vmul.f32 %v398_v3, %v831_v60  ;;  %v406_v61 = vmul.f32 %v404_v11, %v843_v13  ;;  %v408_v62 = vmul.f32 %v404_v11, %v850_v17  ;;  %v444_v57 = vmul.f32 %v441_v38, %v839_v7 }
  0x47   :  { %v448_v63 = vmul.f32 %v447_v41, %v861_v27  ;;  %v450_v2 = vmul.f32 %v447_v41, %v877_v43  ;;  %v374_v4 = vsel %vm174_vm2, %v368_v55, %v366_v54  ;;  %v453_v5 = vadd.f32 %v449_v50, %v443_v48 }
  0x48   :  { %310 = vrot.lane.b32.xlu1 %v309_v34, %s758_s17  ;;  %304 = vrot.lane.b32.xlu0 %v303_v32, %s758_s17  ;;  %v455_v8 = vadd.f32 %v451_v51, %v445_v49  ;;  %v484_v3 = vstv %s624_s18  ;;  %v410_v9 = vadd.f32 %v406_v61, %v400_v56  ;;  %v412_v10 = vadd.f32 %v408_v62, %v402_v58  ;;  %v318_v51 = vld [vmem:[#allocation6 + $0x6] sm:$0x3] }
  0x49   :  { %v452_v14 = vadd.f32 %v448_v63, %v442_v53  ;;  %v454_v11 = vadd.f32 %v450_v2, %v444_v57  ;;  %v490_v15 = vstv %s625_s19  ;;  %v486_v16 = vmul.f32 %v484_v3, %v829_v59 }
  0x4a   :  { %v461_v12 = vsel %vm174_vm2, %v455_v8, %v453_v5  ;;  %v485_v18 = vmul.f32 %v484_v3, %v837_v6  ;;  %v418_v19 = vsel %vm174_vm2, %v412_v10, %v410_v9  ;;  %v487_v20 = vmul.f32 %v484_v3, %v839_v7 }
  0x4b   :  { %v491_v21 = vmul.f32 %v490_v15, %v861_v27  ;;  %v493_v22 = vmul.f32 %v490_v15, %v877_v43  ;;  %v460_v23 = vsel %vm174_vm2, %v454_v11, %v452_v14  ;;  %v488_v24 = vmul.f32 %v484_v3, %v831_v60 }
  0x4c   :  { %v492_v25 = vmul.f32 %v490_v15, %v843_v13  ;;  %v494_v26 = vmul.f32 %v490_v15, %v850_v17  ;;  %v191_v41 = vperm.slane %v189_v39, 0  ;;  %v192_v42 = vperm.slane %v189_v39, 1 }
  0x4d   :  { %376 = vrot.lane.b32.xlu2 %v374_v4, %s759_s20  ;;  %v495_v28 = vadd.f32 %v491_v21, %v485_v18  ;;  %v497_v29 = vadd.f32 %v493_v22, %v487_v20  ;;  %v277_v53 = vperm.slane %v275_v46, 0  ;;  %v278_v54 = vperm.slane %v275_v46, 1 }
  0x4e   :  { %v496_v30 = vadd.f32 %v492_v25, %v486_v16  ;;  %v498_v31 = vadd.f32 %v494_v26, %v488_v24  ;;  %v155_v55 = vstv %s955_s24  ;;  %v329_v56 = vstv %s616_s25 }
  0x4f   :  { %v503_v33 = vsel %vm174_vm2, %v497_v29, %v495_v28  ;;  %v234_v58 = vperm.slane %v232_v47, 0  ;;  %v235_v61 = vperm.slane %v232_v47, 1  ;;  %v335_v62 = vstv %s617_s0 }
  0x50   :  { %419 = vrot.lane.b32.xlu1 %v417_v45, %s760_s21  ;;  %378 = vrot.lane.b32.xlu0 %v375_v52, %s759_s20  ;;  %v504_v32 = vsel %vm174_vm2, %v498_v31, %v496_v30  ;;  %v320_v2 = vperm.slane %v318_v51, 0  ;;  %v321_v4 = vperm.slane %v318_v51, 1  ;;  %v330_v9 = vmul.f32 %v329_v56, %v837_v6 }
  0x51   :  { %v331_v10 = vmul.f32 %v329_v56, %v829_v59  ;;  %v332_v14 = vmul.f32 %v329_v56, %v839_v7  ;;  %v333_v11 = vmul.f32 %v329_v56, %v831_v60  ;;  %v336_v15 = vmul.f32 %v335_v62, %v861_v27 }
  0x52   :  { %v339_v20 = vmul.f32 %v335_v62, %v850_v17 }
  0x53   :  { %v340_v28 = vadd.f32 %v336_v15, %v330_v9 }
  0x54   :  { %v343_v30 = vadd.f32 %v339_v20, %v333_v11 }
  0x55   :  { %421 = vrot.lane.b32.xlu2 %v418_v19, %s760_s21  ;;  %v338_v19 = vmul.f32 %v335_v62, %v877_v43 }
  0x57   :  { %v342_v29 = vadd.f32 %v338_v19, %v332_v14 }
  0x58   :  { %464 = vrot.lane.b32.xlu1 %v461_v12, %s761_s22  ;;  %462 = vrot.lane.b32.xlu0 %v460_v23, %s761_s22  ;;  %v337_v12 = vmul.f32 %v335_v62, %v843_v13  ;;  %v387_v13 = vld [vmem:[#allocation6 + $0xa] sm:$0x3]  ;;  %v516_v62 = vld [vmem:[#allocation6 + $0x10] sm:$0x3] }
  0x59   :  { %v518_v9 = vperm.slane %v516_v62, 0 }
  0x5a   :  { %v341_v17 = vadd.f32 %v337_v12, %v331_v10  ;;  %v519_v10 = vperm.slane %v516_v62, 1 }
  0x5d   :  { %505 = vrot.lane.b32.xlu2 %v503_v33, %s762_s23 }
  0x60   :  { %507 = vrot.lane.b32.xlu0 %v504_v32, %s762_s23  ;;  %v389_v32 = vperm.slane %v387_v13, 0 }
  0x97   :  { %v262_v36 = vpop.permute.xlu2 %261 }
  0x9f   :  { %v268_v40 = vpop.permute.xlu2 %267 }
  0xa0   :  { %v270_v21 = vsel %vm269_vm4, %v268_v40, %v262_v36  ;;  %v273_v6 = vsel %vm269_vm4, %v262_v36, %v268_v40  ;;  %vm569_vm4 = vcmask 1040384  }
  0xa1   :  { %v281_v24 = vmul.f32 %v277_v53, %v273_v6  ;;  %v282_v25 = vmul.f32 %v278_v54, %v270_v21 }
  0xa7   :  { %v377_v3 = vpop.permute.xlu2 %376 }
  0xaa   :  { %v219_v34 = vpop.permute.xlu1 %218  ;;  %v177_v35 = vpop.permute.xlu0 %176 }
  0xaf   :  { %v422_v40 = vpop.permute.xlu2 %421 }
  0xb2   :  { %v225_v37 = vpop.permute.xlu1 %224  ;;  %v183_v38 = vpop.permute.xlu0 %182 }
  0xb3   :  { %v185_v44 = vsel %vm184_vm3, %v183_v38, %v177_v35  ;;  %v188_v45 = vsel %vm184_vm3, %v177_v35, %v183_v38  ;;  %v227_v57 = vsel %vm226_vm5, %v225_v37, %v219_v34  ;;  %v230_v63 = vsel %vm226_vm5, %v219_v34, %v225_v37  ;;  %v430_v35 = vld [vmem:[#allocation6 + $0xc] sm:$0x3] }
  0xb4   :  { %v195_v48 = vmul.f32 %v191_v41, %v188_v45  ;;  %v196_v49 = vmul.f32 %v192_v42, %v185_v44  ;;  %v238_v16 = vmul.f32 %v234_v58, %v230_v63  ;;  %v239_v18 = vmul.f32 %v235_v61, %v227_v57  ;;  %v473_v45 = vld [vmem:[#allocation6 + $0xe] sm:$0x3] }
  0xb5   :  { %v390_v34 = vperm.slane %v387_v13, 1  ;;  %v348_v41 = vsel %vm174_vm2, %v342_v29, %v340_v28  ;;  %v349_v42 = vsel %vm174_vm2, %v343_v30, %v341_v17  ;;  %v432_v44 = vperm.slane %v430_v35, 0 }
  0xb6   :  { %v197_v5 = vadd.f32 %v195_v48, %v155_v55  ;;  %v198_v8 = vadd.f32 %v196_v49, %v155_v55  ;;  %v433_v48 = vperm.slane %v430_v35, 1  ;;  %v475_v55 = vperm.slane %v473_v45, 0 }
  0xb7   :  { %v476_v56 = vperm.slane %v473_v45, 1 }
  0xb8   :  { %v240_v22 = vadd.f32 %v238_v16, %v197_v5  ;;  %v241_v60 = vadd.f32 %v239_v18, %v198_v8 }
  0xba   :  { %v311_v50 = vpop.permute.xlu1 %310  ;;  %v305_v52 = vpop.permute.xlu0 %304  ;;  %v283_v31 = vadd.f32 %v281_v24, %v240_v22  ;;  %v284_v33 = vadd.f32 %v282_v25, %v241_v60 }
  0xbb   :  { %v313_v59 = vsel %vm312_vm6, %v311_v50, %v305_v52  ;;  %v316_v7 = vsel %vm312_vm6, %v305_v52, %v311_v50 }
  0xbc   :  { %v324_v26 = vmul.f32 %v320_v2, %v316_v7  ;;  %v325_v43 = vmul.f32 %v321_v4, %v313_v59 }
  0xbe   :  { %v326_v38 = vadd.f32 %v324_v26, %v283_v31  ;;  %v327_v39 = vadd.f32 %v325_v43, %v284_v33 }
  0xc0   :  { %v352_v53 = vadd.f32 %v348_v41, %v326_v38  ;;  %v353_v54 = vadd.f32 %v349_v42, %v327_v39 }
  0xc2   :  { %v420_v23 = vpop.permute.xlu1 %419  ;;  %v379_v27 = vpop.permute.xlu0 %378 }
  0xc3   :  { %v381_v36 = vsel %vm380_vm7, %v377_v3, %v379_v27  ;;  %v385_v37 = vsel %vm380_vm7, %v379_v27, %v377_v3  ;;  %v424_v51 = vsel %vm423_vm8, %v420_v23, %v422_v40  ;;  %v428_v52 = vsel %vm423_vm8, %v422_v40, %v420_v23  ;;  %v506_v3 = vpop.permute.xlu2 %505 }
  0xc4   :  { %v393_v46 = vmul.f32 %v389_v32, %v381_v36  ;;  %v394_v47 = vmul.f32 %v390_v34, %v385_v37  ;;  %v436_v2 = vmul.f32 %v432_v44, %v424_v51  ;;  %v437_v4 = vmul.f32 %v433_v48, %v428_v52 }
  0xc6   :  { %v395_v57 = vadd.f32 %v393_v46, %v352_v53  ;;  %v396_v63 = vadd.f32 %v394_v47, %v353_v54 }
  0xc8   :  { %v438_v14 = vadd.f32 %v436_v2, %v395_v57  ;;  %v439_v11 = vadd.f32 %v437_v4, %v396_v63 }
  0xca   :  { %v465_v49 = vpop.permute.xlu1 %464  ;;  %v463_v50 = vpop.permute.xlu0 %462 }
  0xcb   :  { %v467_v58 = vsel %vm466_vm9, %v463_v50, %v465_v49  ;;  %v471_v61 = vsel %vm466_vm9, %v465_v49, %v463_v50 }
  0xcc   :  { %v479_v5 = vmul.f32 %v475_v55, %v467_v58  ;;  %v480_v8 = vmul.f32 %v476_v56, %v471_v61 }
  0xce   :  { %v481_v18 = vadd.f32 %v479_v5, %v438_v14  ;;  %v482_v19 = vadd.f32 %v480_v8, %v439_v11 }
  0xd2   :  { %v508_v15 = vpop.permute.xlu0 %507 }
  0xd3   :  { %v510_v12 = vsel %vm509_vm10, %v506_v3, %v508_v15  ;;  %v514_v16 = vsel %vm509_vm10, %v508_v15, %v506_v3 }
  0xd4   :  { %v522_v20 = vmul.f32 %v518_v9, %v510_v12  ;;  %v523_v21 = vmul.f32 %v519_v10, %v514_v16 }
  0xd6   :  { %v524_v6 = vadd.f32 %v522_v20, %v481_v18  ;;  %v525_v59 = vadd.f32 %v523_v21, %v482_v19 }
  0xd8   :  { %v526_v7 = vmax.f32 %v524_v6, 0.0  ;;  %v527_v22 = vmax.f32 %v525_v59, 0.0 }
  0xda   :  { %v626_v60 = vmul.f32 -1.442695, %v526_v7  ;;  %v627_v23 = vmul.f32 -1.442695, %v527_v22 }
  0xdc   :  { %647 = vpow2.f32 %v626_v60 }
  0xdd   :  { %649 = vpow2.f32 %v627_v23 }
  0xe2   :  { %v648_v27 = vpop.eup %647 }
  0xe3   :  { %v650_v13 = vpop.eup %649  ;;  %v534_v24 = vadd.f32 1.0, %v648_v27 }
  0xe4   :  { %v535_v25 = vadd.f32 1.0, %v650_v13 }
  0xe5   :  { %651 = vrcp.f32 %v534_v24  ;;  %vm541_vm13 = vweird.f32 %v534_v24  ;;  %v547_v36 = vand.u32 2147483648, %v534_v24  ;;  %v545_v37 = vand.u32 2147483647, %v534_v24 }
  0xe6   :  { %653 = vrcp.f32 %v535_v25  ;;  %v562_v33 = vand.u32 2147483648, %v535_v25  ;;  %v560_v34 = vand.u32 2147483647, %v535_v25  ;;  %vm556_vm14 = vweird.f32 %v535_v25 }
  0xe7   :  { %v548_v42 = vor.u32 1.1754944e-38, %v547_v36  ;;  %vm546_vm5 = vcmp.eq.f32.partialorder %v545_v37, 8.507059e+37 }
  0xe8   :  { %v563_v39 = vor.u32 1.1754944e-38, %v562_v33  ;;  %vm561_vm3 = vcmp.eq.f32.partialorder %v560_v34, 8.507059e+37 }
  0xeb   :  { %v652_v26 = vpop.eup %651 }
  0xec   :  { %v654_v43 = vpop.eup %653  ;;  %v537_v28 = vmul.f32 %v652_v26, %v534_v24  ;;  %vm542_vm11 = vweird.f32 %v652_v26 }
  0xed   :  { %v552_v17 = vmul.f32 %v654_v43, %v535_v25  ;;  %vm557_vm12 = vweird.f32 %v654_v43  ;;  %vm543_vm15 = vmor %vm541_vm13, %vm542_vm11 }
  0xee   :  { %v538_v29 = vsub.f32 1.0, %v537_v28  ;;  %vm558_vm1 = vmor %vm556_vm14, %vm557_vm12 }
  0xef   :  { %v553_v30 = vsub.f32 1.0, %v552_v17 }
  0xf0   :  { %v539_v31 = vmul.f32 %v652_v26, %v538_v29 }
  0xf1   :  { %v554_v32 = vmul.f32 %v654_v43, %v553_v30 }
  0xf2   :  { %v540_v35 = vadd.f32 %v652_v26, %v539_v31 }
  0xf3   :  { %v555_v38 = vadd.f32 %v654_v43, %v554_v32 }
  0xf4   :  { %v544_v40 = vsel %vm543_vm15, %v652_v26, %v540_v35 }
  0xf5   :  { %v559_v41 = vsel %vm558_vm1, %v654_v43, %v555_v38  ;;  %v549_v46 = vsel %vm546_vm5, %v548_v42, %v544_v40 }
  0xf6   :  { %v564_v44 = vsel %vm561_vm3, %v563_v39, %v559_v41 }
  0xf7   :  { %v568_v45 = vrot.slane %v564_v44, 7 }
  0xf9   :  { %v570_v47 = vsel %vm569_vm4, %v549_v46, %v568_v45  ;;  %v571_v48 = vsel %vm174_vm2, %v549_v46, %v568_v45 }
  0xfa   :  { %v572_v49 = vrot.slane %v571_v48, 1  ;;  %v574_v50 = vperm.slane %v570_v47, 1  ;;  %v573_v51 = vperm.slane %v570_v47, 0 }
  0xfc   :  { %v576_v52 = vperm.slane %v572_v49, 1  ;;  %v577_v53 = vrot.slane %v574_v50, 4  ;;  %v575_v54 = vperm.slane %v572_v49, 0 }
  0xfe   :  { %v578_v55 = vrot.slane %v576_v52, 4  ;;  %v579_v56 = vsel %vm75_vm0, %v573_v51, %v577_v53 }
  0xff   :  { %v583_v58 = vmul.f32 %v579_v56, %v796_v0 }
 0x100   :  { %v580_v61 = vsel %vm75_vm0, %v575_v54, %v578_v55 }
 0x101   :  { %v584_v62 = vmul.f32 %v580_v61, %v798_v1  ;;  %585 = vst [vmem:[#allocation9] sm:$0xff] %v583_v58 }
 0x103   :  { %586 = vst [vmem:[#allocation9 + $0x8] sm:$0xff] %v584_v62 }
 0x104   :  { %599 = dma.vmem_to_hbm [thread:$0]  %s592_s1, 256, %s594_s30, [#allocation4], %s752_s27, %s752_s27, %s753_s28  }
 0x105   :  { %745 = dma.done.wait [#allocation4], 256  }
 0x106   :  { %746 = vsyncadd [#allocation4], 4294967040 }
 0x107   :  { %604 = vsyncpa [#allocation3], 1 }
 0x108   :  { %605 = vsyncpa [#allocation8], 1 }
 0x109   :  { %606 = vsyncpa [#allocation4], 1 }
 0x10a   :  { %607 = vsyncpa [#allocation5], 1 }

</bundles_post_ra>
